<compile_context>
chip_gen: v6e
topology: v6e:2x2x1
jax: 0.10.0
libtpu: 0.0.40
codegen_flags: <defaults>
</compile_context>

<pallas_src>
import jax
import jax.numpy as jnp
from jax.experimental import pallas as pl
from jax.experimental.pallas import tpu as pltpu


def _round_up(x, n):
    return (x + n - 1) // n * n


def ffn_kernel(x_ref, w1_ref, b1_ref, w2_ref, b2_ref, o_ref, acc_ref):
    k = pl.program_id(1)

    @pl.when(k == 0)
    def _init():
        # Seed the accumulator with the output bias (broadcast over rows).
        acc_ref[...] = jnp.broadcast_to(
            b2_ref[...].astype(jnp.float32), acc_ref.shape)

    # layer1 chunk: x_tile @ W1[:, k*TH:(k+1)*TH] + b1_chunk (f32 accumulate).
    h = jnp.dot(x_ref[...], w1_ref[...], preferred_element_type=jnp.float32)
    h = h + b1_ref[...].astype(jnp.float32)

    # Exact GELU (erf-based, matches torch.nn.GELU default); runs on the EUP
    # per hid-chunk so it hides under the MXU work.
    h = 0.5 * h * (1.0 + jax.lax.erf(h * 0.7071067811865476))

    # layer2 chunk: accumulate into the VMEM f32 scratch.  Cast back to the
    # weight dtype so bf16 weights run the MXU at the bf16 rate.
    acc_ref[...] += jnp.dot(
        h.astype(w2_ref.dtype), w2_ref[...], preferred_element_type=jnp.float32)

    @pl.when(k == pl.num_programs(1) - 1)
    def _finalize():
        o_ref[...] = acc_ref[...].astype(o_ref.dtype)


def _pick_tiles(m, d_pad, h_pad, itemsize, budget_bytes=48 * 1024 * 1024):
    """Pick the largest (TM, TH) whose double-buffered working set fits budget."""
    tm_full = _round_up(m, 8)
    th_cands = [t for t in (1024, 512, 256, 128) if h_pad % t == 0]
    tm_cands = (512, 256, 128, 64, 32, 16, 8)

    def need(tm, th):
        # 2x (double-buffered) inputs + 2x output + f32 accumulator scratch.
        inputs = (tm * d_pad + d_pad * th + th + th * d_pad + d_pad) * itemsize
        out = tm * d_pad * itemsize
        acc = tm * d_pad * 4
        return 2 * inputs + 2 * out + acc

    for th in th_cands:
        for tm in tm_cands:
            tm_e = min(tm, tm_full)
            if need(tm_e, th) <= budget_bytes:
                return tm_e, th, need(tm_e, th)
    tm_e = min(8, tm_full)
    th = th_cands[-1]
    return tm_e, th, need(tm_e, th)


def ffn_forward(x, w1, b1, w2, b2):
    """x: [..., in_dim]; w1: [in_dim, hid]; b1: [hid]; w2: [hid, in_dim]; b2: [in_dim]."""
    in_dim = x.shape[-1]
    hid = w1.shape[1]
    lead_shape = x.shape[:-1]
    x2d = x.reshape(-1, in_dim)
    m = x2d.shape[0]

    d_pad = _round_up(in_dim, 128)
    h_pad = _round_up(hid, 128)
    itemsize = jnp.dtype(x.dtype).itemsize
    tm, th, vmem_need = _pick_tiles(m, d_pad, h_pad, itemsize)
    m_pad = _round_up(m, tm)

    # Zero-pad to aligned shapes.  Zeros are harmless: padded x / W1 / W2
    # rows & cols contribute 0 (GELU(0) = 0) and padded output rows/cols are
    # sliced off below.
    xp = jnp.pad(x2d, ((0, m_pad - m), (0, d_pad - in_dim)))
    w1p = jnp.pad(w1, ((0, d_pad - in_dim), (0, h_pad - hid)))
    b1p = jnp.pad(b1, (0, h_pad - hid)).reshape(1, h_pad)
    w2p = jnp.pad(w2, ((0, h_pad - hid), (0, d_pad - in_dim)))
    b2p = jnp.pad(b2, (0, d_pad - in_dim)).reshape(1, d_pad)

    grid = (m_pad // tm, h_pad // th)  # M parallel (megacore), hid reduction last

    cost = pl.CostEstimate(
        flops=4 * m_pad * d_pad * h_pad,          # two GEMMs
        transcendentals=m_pad * h_pad,            # erf per hidden element
        bytes_accessed=(xp.size + w1p.size + b1p.size + w2p.size + b2p.size
                        + m_pad * d_pad) * itemsize,
    )

    out = pl.pallas_call(
        ffn_kernel,
        out_shape=jax.ShapeDtypeStruct((m_pad, d_pad), x.dtype),
        grid_spec=pltpu.PrefetchScalarGridSpec(
            num_scalar_prefetch=0,
            grid=grid,
            in_specs=[
                pl.BlockSpec((tm, d_pad), lambda i, k: (i, 0)),   # x row tile
                pl.BlockSpec((d_pad, th), lambda i, k: (0, k)),   # W1 hid chunk
                pl.BlockSpec((1, th), lambda i, k: (0, k)),       # b1 chunk
                pl.BlockSpec((th, d_pad), lambda i, k: (k, 0)),   # W2 hid chunk
                pl.BlockSpec((1, d_pad), lambda i, k: (0, 0)),    # b2 (resident)
            ],
            out_specs=pl.BlockSpec((tm, d_pad), lambda i, k: (i, 0)),
            scratch_shapes=[pltpu.VMEM((tm, d_pad), jnp.float32)],
        ),
        compiler_params=pltpu.CompilerParams(
            dimension_semantics=("parallel", "arbitrary"),
            vmem_limit_bytes=int(min(max(2 * vmem_need, 32 << 20), 100 << 20)),
        ),
        cost_estimate=cost,
    )(xp, w1p, b1p, w2p, b2p)

    return out[:m, :in_dim].reshape(*lead_shape, in_dim)


def init_ffn_params(key, in_dim, hid_dim, dtype=jnp.float32):
    """Deterministic init mimicking torch.nn.Linear (uniform +-1/sqrt(fan_in))."""
    k1, k2, k3, k4 = jax.random.split(key, 4)
    bound1 = 1.0 / jnp.sqrt(in_dim)
    bound2 = 1.0 / jnp.sqrt(hid_dim)
    w1 = jax.random.uniform(k1, (in_dim, hid_dim), dtype, -bound1, bound1)
    b1 = jax.random.uniform(k2, (hid_dim,), dtype, -bound1, bound1)
    w2 = jax.random.uniform(k3, (hid_dim, in_dim), dtype, -bound2, bound2)
    b2 = jax.random.uniform(k4, (in_dim,), dtype, -bound2, bound2)
    return w1, b1, w2, b2


if __name__ == "__main__":
    batch, seq, in_dim, hid_dim = 2, 8, 32, 64

    key = jax.random.PRNGKey(0)
    kx, kp = jax.random.split(key)
    x = jax.random.normal(kx, (batch, seq, in_dim), jnp.float32)
    w1, b1, w2, b2 = init_ffn_params(kp, in_dim, hid_dim)

    out = ffn_forward(x, w1, b1, w2, b2)
    out = jax.block_until_ready(out)

    # sanity check vs pure-JAX reference (erf GELU == torch.nn.GELU default)
    h_ref = x @ w1 + b1
    h_ref = 0.5 * h_ref * (1.0 + jax.lax.erf(h_ref / jnp.sqrt(2.0)))
    ref = h_ref @ w2 + b2
    assert out.shape == (batch, seq, in_dim)
    assert jnp.allclose(out, ref, atol=1e-5, rtol=1e-5), float(
        jnp.max(jnp.abs(out - ref)))

    print("KERNEL_OK")
</pallas_src>

<mosaic_0001>
module attributes {stable_mosaic.version = 11 : i64} {
  func.func @ffn_kernel(%arg0: i32, %arg1: i32, %arg2: memref<16x128xf32, #tpu.memory_space<vmem>>, %arg3: memref<128x128xf32, #tpu.memory_space<vmem>>, %arg4: memref<1x128xf32, #tpu.memory_space<vmem>>, %arg5: memref<128x128xf32, #tpu.memory_space<vmem>>, %arg6: memref<1x128xf32, #tpu.memory_space<vmem>>, %arg7: memref<16x128xf32, #tpu.memory_space<vmem>>, %arg8: memref<16x128xf32, #tpu.memory_space<vmem>>) attributes {dimension_semantics = [#tpu.dimension_semantics<parallel>, #tpu.dimension_semantics<arbitrary>], iteration_bounds = array<i64: 1, 1>, scalar_prefetch = 0 : i64, scratch_operands = 1 : i64, tpu.core_type = #tpu.core_type<tc>, window_params = [{transform_indices = @transform_0, window_bounds = array<i64: 16, 128>}, {transform_indices = @transform_1, window_bounds = array<i64: 128, 128>}, {transform_indices = @transform_2, window_bounds = array<i64: 1, 128>}, {transform_indices = @transform_3, window_bounds = array<i64: 128, 128>}, {pipeline_mode = #tpu.pipeline_mode<synchronous>, transform_indices = @transform_4, window_bounds = array<i64: 1, 128>}, {transform_indices = @transform_5, window_bounds = array<i64: 16, 128>}]} {
    %c0_i32 = arith.constant 0 : i32
    %0 = arith.cmpi eq, %arg1, %c0_i32 : i32
    %1 = arith.extui %0 : i1 to i32
    %c0_i32_0 = arith.constant 0 : i32
    %2 = arith.cmpi ne, %1, %c0_i32_0 : i32
    scf.if %2 {
      %c0_18 = arith.constant 0 : index
      %c0_19 = arith.constant 0 : index
      %25 = vector.load %arg6[%c0_18, %c0_19] : memref<1x128xf32, #tpu.memory_space<vmem>>, vector<1x128xf32>
      %26 = vector.shape_cast %25 : vector<1x128xf32> to vector<1x128xf32>
      %27 = vector.broadcast %26 : vector<1x128xf32> to vector<16x128xf32>
      %c0_20 = arith.constant 0 : index
      %c0_21 = arith.constant 0 : index
      %28 = vector.load %arg8[%c0_20, %c0_21] : memref<16x128xf32, #tpu.memory_space<vmem>>, vector<16x128xf32>
      tpu.vector_store %arg8[%c0_20, %c0_21], %27 {strides = array<i32>} : memref<16x128xf32, #tpu.memory_space<vmem>>, vector<16x128xf32>,
    } else {
    }
    %c0 = arith.constant 0 : index
    %c0_1 = arith.constant 0 : index
    %3 = vector.load %arg2[%c0, %c0_1] : memref<16x128xf32, #tpu.memory_space<vmem>>, vector<16x128xf32>
    %c0_2 = arith.constant 0 : index
    %c0_3 = arith.constant 0 : index
    %4 = vector.load %arg3[%c0_2, %c0_3] : memref<128x128xf32, #tpu.memory_space<vmem>>, vector<128x128xf32>
    %cst = arith.constant dense<0.000000e+00> : vector<16x128xf32>
    %5 = tpu.matmul %3, %4, %cst {dimension_numbers = #tpu.dot_dimension_numbers<[1], [0], [0], [1], [0, 0, 1, 1], [], []>} : vector<16x128xf32>, vector<128x128xf32>, vector<16x128xf32> -> vector<16x128xf32>
    %c0_4 = arith.constant 0 : index
    %c0_5 = arith.constant 0 : index
    %6 = vector.load %arg4[%c0_4, %c0_5] : memref<1x128xf32, #tpu.memory_space<vmem>>, vector<1x128xf32>
    %7 = vector.broadcast %6 : vector<1x128xf32> to vector<16x128xf32>
    %8 = arith.addf %5, %7 : vector<16x128xf32>
    %cst_6 = arith.constant 5.000000e-01 : f32
    %9 = vector.broadcast %cst_6 : f32 to vector<16x128xf32>
    %10 = arith.mulf %9, %8 : vector<16x128xf32>
    %cst_7 = arith.constant 0.707106769 : f32
    %11 = vector.broadcast %cst_7 : f32 to vector<16x128xf32>
    %12 = arith.mulf %8, %11 : vector<16x128xf32>
    %13 = math.erf %12 : vector<16x128xf32>
    %cst_8 = arith.constant 1.000000e+00 : f32
    %14 = vector.broadcast %cst_8 : f32 to vector<16x128xf32>
    %15 = arith.addf %14, %13 : vector<16x128xf32>
    %16 = arith.mulf %10, %15 : vector<16x128xf32>
    %c0_9 = arith.constant 0 : index
    %c0_10 = arith.constant 0 : index
    %17 = vector.load %arg8[%c0_9, %c0_10] : memref<16x128xf32, #tpu.memory_space<vmem>>, vector<16x128xf32>
    %c0_11 = arith.constant 0 : index
    %c0_12 = arith.constant 0 : index
    %18 = vector.load %arg5[%c0_11, %c0_12] : memref<128x128xf32, #tpu.memory_space<vmem>>, vector<128x128xf32>
    %cst_13 = arith.constant dense<0.000000e+00> : vector<16x128xf32>
    %19 = tpu.matmul %16, %18, %cst_13 {dimension_numbers = #tpu.dot_dimension_numbers<[1], [0], [0], [1], [0, 0, 1, 1], [], []>} : vector<16x128xf32>, vector<128x128xf32>, vector<16x128xf32> -> vector<16x128xf32>
    %20 = arith.addf %17, %19 : vector<16x128xf32>
    %c0_14 = arith.constant 0 : index
    %c0_15 = arith.constant 0 : index
    %21 = vector.load %arg8[%c0_14, %c0_15] : memref<16x128xf32, #tpu.memory_space<vmem>>, vector<16x128xf32>
    tpu.vector_store %arg8[%c0_14, %c0_15], %20 {strides = array<i32>} : memref<16x128xf32, #tpu.memory_space<vmem>>, vector<16x128xf32>,
    %c0_i32_16 = arith.constant 0 : i32
    %22 = arith.cmpi eq, %arg1, %c0_i32_16 : i32
    %23 = arith.extui %22 : i1 to i32
    %c0_i32_17 = arith.constant 0 : i32
    %24 = arith.cmpi ne, %23, %c0_i32_17 : i32
    scf.if %24 {
      %c0_18 = arith.constant 0 : index
      %c0_19 = arith.constant 0 : index
      %25 = vector.load %arg8[%c0_18, %c0_19] : memref<16x128xf32, #tpu.memory_space<vmem>>, vector<16x128xf32>
      %c0_20 = arith.constant 0 : index
      %c0_21 = arith.constant 0 : index
      %26 = vector.load %arg7[%c0_20, %c0_21] : memref<16x128xf32, #tpu.memory_space<vmem>>, vector<16x128xf32>
      tpu.vector_store %arg7[%c0_20, %c0_21], %25 {strides = array<i32>} : memref<16x128xf32, #tpu.memory_space<vmem>>, vector<16x128xf32>,
    } else {
    }
    return
  }
  func.func @transform_0(%arg0: i32, %arg1: i32) -> (i32, i32) {
    %c0_i32 = arith.constant 0 : i32
    %c0_i32_0 = arith.constant 0 : i32
    return %arg0, %c0_i32 : i32, i32
  }
  func.func @transform_1(%arg0: i32, %arg1: i32) -> (i32, i32) {
    %c0_i32 = arith.constant 0 : i32
    %c0_i32_0 = arith.constant 0 : i32
    return %c0_i32, %arg1 : i32, i32
  }
  func.func @transform_2(%arg0: i32, %arg1: i32) -> (i32, i32) {
    %c0_i32 = arith.constant 0 : i32
    %c0_i32_0 = arith.constant 0 : i32
    return %c0_i32, %arg1 : i32, i32
  }
  func.func @transform_3(%arg0: i32, %arg1: i32) -> (i32, i32) {
    %c0_i32 = arith.constant 0 : i32
    %c0_i32_0 = arith.constant 0 : i32
    return %arg1, %c0_i32 : i32, i32
  }
  func.func @transform_4(%arg0: i32, %arg1: i32) -> (i32, i32) {
    %c0_i32 = arith.constant 0 : i32
    %c0_i32_0 = arith.constant 0 : i32
    %c0_i32_1 = arith.constant 0 : i32
    return %c0_i32, %c0_i32_0 : i32, i32
  }
  func.func @transform_5(%arg0: i32, %arg1: i32) -> (i32, i32) {
    %c0_i32 = arith.constant 0 : i32
    %c0_i32_0 = arith.constant 0 : i32
    return %arg0, %c0_i32 : i32, i32
  }
}

</mosaic_0001>

<bundles_post_ra>
// kernel: tpu_custom_call.1
= control target key start
LH: loop header
LB: loop body
LE: loop exit
PB: predicated region body
PF: predicated region fallthrough
CT: control target
= control target key end

     0   :  { %10 = vsyncpa [#allocation4], 0  ;;  %s577_s0 = inlined_call_operand.hbm [shape: f32[16,128], index: 0, kind: input, shape index: {}]   ;;  %s578_s1 = inlined_call_operand.hbm [shape: f32[128,128], index: 1, kind: input, shape index: {}]   ;;  %s579_s2 = inlined_call_operand.vmem [shape: f32[1,128], index: 2, kind: input, shape index: {}]   ;;  %s580_s3 = inlined_call_operand.hbm [shape: f32[128,128], index: 3, kind: input, shape index: {}]   ;;  %s581_s4 = inlined_call_operand.vmem [shape: f32[1,128], index: 4, kind: input, shape index: {}]   ;;  %s582_s5 = inlined_call_operand.hbm [shape: f32[16,128], index: 5, kind: output, shape index: {}]  }
   0x1   :  { %11 = vsyncpa [#allocation7], 0 }
   0x2   :  { %12 = vsyncpa [#allocation5], 0  ;;  %s511_s18 = smov [#allocation6]   ;;  %s512_s20 = smov [#allocation3]  }
   0x3   :  { %s30_s19 = sshll.u32 %s511_s18, 4  ;;  %s18_s21 = sshll.u32 %s512_s20, 4  ;;  %s31_s19 = int_to_ptr.vmem [resolvable:$true] %s30_s19  ;;  %s19_s21 = int_to_ptr.vmem [resolvable:$true] %s18_s21 }
   0x4   :  { %s433_s22 = scalar_lea.vmem %s31_s19, 2048  ;;  %p438_p1 = scmp.lt.s32.totalorder %s31_s19, %s31_s19 }
   0x5   :  { %p434_p0 = scmp.ne.s32.totalorder %s31_s19, %s433_s22  ;;  %p439_p2 = scmp.lt.s32.totalorder %s433_s22, %s433_s22 }
   0x7   :  { %p440_p3 = por %p439_p2, %p438_p1 }
   0x9   :  { %p441_p4 = pnand %p440_p3, %p434_p0 }
   0xb   :  { %444 = shalt.err (!%p441_p4)
}
   0xc   :  { %s513_s23 = smov 128   ;;  %s514_s24 = smov 8  }
   0xd   :  { %36 = dma.hbm_to_vmem [thread:$0]  %s578_s1, 2048, %s31_s19, [#allocation7], %s513_s23, %s513_s23, %s514_s24  }
   0xe   :  { %s453_s27 = scalar_lea.vmem %s19_s21, 256  ;;  %p458_p6 = scmp.lt.s32.totalorder %s19_s21, %s19_s21 }
   0xf   :  { %p454_p5 = scmp.ne.s32.totalorder %s19_s21, %s453_s27  ;;  %p459_p7 = scmp.lt.s32.totalorder %s453_s27, %s453_s27 }
  0x11   :  { %p460_p8 = por %p459_p7, %p458_p6 }
  0x13   :  { %p461_p9 = pnand %p460_p8, %p454_p5 }
  0x15   :  { %464 = shalt.err (!%p461_p9)
}
  0x16   :  { %24 = dma.hbm_to_vmem [thread:$0]  %s577_s0, 256, %s19_s21, [#allocation4], %s513_s23, %s513_s23, %s514_s24  }
  0x17   :  { %s515_s30 = smov [#allocation8]  }
  0x18   :  { %s44_s6 = sshll.u32 %s515_s30, 4  ;;  %s45_s6 = int_to_ptr.vmem [resolvable:$true] %s44_s6 }
  0x19   :  { %s473_s7 = scalar_lea.vmem %s45_s6, 2048  ;;  %p478_p11 = scmp.lt.s32.totalorder %s45_s6, %s45_s6 }
  0x1a   :  { %p474_p10 = scmp.ne.s32.totalorder %s45_s6, %s473_s7  ;;  %p479_p12 = scmp.lt.s32.totalorder %s473_s7, %s473_s7 }
  0x1c   :  { %p480_p13 = por %p479_p12, %p478_p11 }
  0x1e   :  { %p481_p0 = pnand %p480_p13, %p474_p10 }
  0x20   :  { %484 = shalt.err (!%p481_p0)
}
  0x21   :  { %50 = dma.hbm_to_vmem [thread:$0]  %s580_s3, 2048, %s45_s6, [#allocation7], %s513_s23, %s513_s23, %s514_s24  }
  0x22   :  { %505 = dma.done.wait [#allocation4], 256  }
  0x23   :  { %506 = vsyncadd [#allocation4], 4294967040 }
  0x24   :  { %507 = dma.done.wait [#allocation7], 4096  }
  0x25   :  { %508 = vsyncadd [#allocation7], 4294963200  ;;  %v92_v0 = vld [vmem:[#allocation6 + $0x78] sm:$0xff]  ;;  %v91_v1 = vld [vmem:[#allocation6 + $0x70] sm:$0xff]  ;;  %s516_s10 = smov [#allocation9]  }
  0x26   :  { %345 = vmatprep.subr.mxu0 %v92_v0  ;;  %v90_v2 = vld [vmem:[#allocation6 + $0x68] sm:$0xff]  ;;  %v89_v3 = vld [vmem:[#allocation6 + $0x60] sm:$0xff]  ;;  %v75_v4 = vld [vmem:[#allocation3] sm:$0xff]  ;;  %s294_s11 = sshll.u32 %s516_s10, 4  ;;  %s295_s11 = int_to_ptr.vmem [resolvable:$true] %s294_s11 }
  0x27   :  { %346 = vmatpush3.msra.mxu0 %v92_v0  ;;  %v88_v5 = vld [vmem:[#allocation6 + $0x58] sm:$0xff]  ;;  %377 = vmatprep.mubr.f32.mxu0 %v75_v4  ;;  %v201_v7 = vld [vmem:[#allocation8 + $0x70] sm:$0xff]  ;;  %v200_v9 = vld [vmem:[#allocation8 + $0x68] sm:$0xff]  ;;  %s485_s12 = scalar_lea.vmem %s295_s11, 256  ;;  %p490_p2 = scmp.lt.s32.totalorder %s295_s11, %s295_s11 }
  0x28   :  { %347 = vmatprep.subr.mxu0 %v91_v1  ;;  %v202_v6 = vld [vmem:[#allocation8 + $0x78] sm:$0xff]  ;;  %v87_v8 = vld [vmem:[#allocation6 + $0x50] sm:$0xff]  ;;  %v86_v10 = vld [vmem:[#allocation6 + $0x48] sm:$0xff]  ;;  %p486_p1 = scmp.ne.s32.totalorder %s295_s11, %s485_s12  ;;  %p491_p3 = scmp.lt.s32.totalorder %s485_s12, %s485_s12 }
  0x29   :  { %348 = vmatpush3.msra.mxu0 %v91_v1  ;;  %380 = vmatprep.subr.mxu1 %v202_v6  ;;  %v85_v11 = vld [vmem:[#allocation6 + $0x40] sm:$0xff]  ;;  %v84_v12 = vld [vmem:[#allocation6 + $0x38] sm:$0xff]  ;;  %v83_v13 = vld [vmem:[#allocation6 + $0x30] sm:$0xff] }
  0x2a   :  { %349 = vmatprep.subr.mxu0 %v90_v2  ;;  %381 = vmatpush3.msra.mxu1 %v202_v6  ;;  %v82_v14 = vld [vmem:[#allocation6 + $0x28] sm:$0xff]  ;;  %v81_v15 = vld [vmem:[#allocation6 + $0x20] sm:$0xff]  ;;  %v80_v16 = vld [vmem:[#allocation6 + $0x18] sm:$0xff]  ;;  %p492_p4 = por %p491_p3, %p490_p2 }
  0x2b   :  { %350 = vmatpush3.msra.mxu0 %v90_v2  ;;  %382 = vmatprep.subr.mxu1 %v201_v7  ;;  %v79_v17 = vld [vmem:[#allocation6 + $0x10] sm:$0xff]  ;;  %v78_v18 = vld [vmem:[#allocation6 + $0x8] sm:$0xff]  ;;  %v77_v19 = vld [vmem:[#allocation6] sm:$0xff] }
  0x2c   :  { %351 = vmatprep.subr.mxu0 %v89_v3  ;;  %383 = vmatpush3.msra.mxu1 %v201_v7  ;;  %v76_v20 = vld [vmem:[#allocation3 + $0x8] sm:$0xff]  ;;  %v199_v21 = vld [vmem:[#allocation8 + $0x60] sm:$0xff]  ;;  %v197_v23 = vld [vmem:[#allocation8 + $0x50] sm:$0xff]  ;;  %p493_p5 = pnand %p492_p4, %p486_p1 }
  0x2d   :  { %352 = vmatpush3.msra.mxu0 %v89_v3  ;;  %384 = vmatprep.subr.mxu1 %v200_v9  ;;  %v198_v22 = vld [vmem:[#allocation8 + $0x58] sm:$0xff]  ;;  %v196_v24 = vld [vmem:[#allocation8 + $0x48] sm:$0xff]  ;;  %v195_v25 = vld [vmem:[#allocation8 + $0x40] sm:$0xff] }
  0x2e   :  { %353 = vmatprep.subr.mxu0 %v88_v5  ;;  %385 = vmatpush3.msra.mxu1 %v200_v9  ;;  %v194_v26 = vld [vmem:[#allocation8 + $0x38] sm:$0xff]  ;;  %v193_v27 = vld [vmem:[#allocation8 + $0x30] sm:$0xff]  ;;  %v192_v28 = vld [vmem:[#allocation8 + $0x28] sm:$0xff] }
  0x2f   :  { %354 = vmatpush3.msra.mxu0 %v88_v5  ;;  %386 = vmatprep.subr.mxu1 %v199_v21  ;;  %v191_v29 = vld [vmem:[#allocation8 + $0x20] sm:$0xff]  ;;  %v190_v30 = vld [vmem:[#allocation8 + $0x18] sm:$0xff]  ;;  %v189_v31 = vld [vmem:[#allocation8 + $0x10] sm:$0xff] }
  0x30   :  { %355 = vmatprep.subr.mxu0 %v87_v8  ;;  %387 = vmatpush3.msra.mxu1 %v199_v21  ;;  %v188_v32 = vld [vmem:[#allocation8 + $0x8] sm:$0xff]  ;;  %v187_v33 = vld [vmem:[#allocation8] sm:$0xff]  ;;  %v308_v34 = vld [vmem:[%s579_s2] ss:$0 sm:$0xff] }
  0x31   :  { %356 = vmatpush3.msra.mxu0 %v87_v8  ;;  %388 = vmatprep.subr.mxu1 %v198_v22  ;;  %v307_v49 = vld [vmem:[%s581_s4] ss:$0 sm:$0xff] }
  0x32   :  { %357 = vmatprep.subr.mxu0 %v86_v10  ;;  %389 = vmatpush3.msra.mxu1 %v198_v22 }
  0x33   :  { %358 = vmatpush3.msra.mxu0 %v86_v10  ;;  %390 = vmatprep.subr.mxu1 %v197_v23 }
  0x34   :  { %359 = vmatprep.subr.mxu0 %v85_v11  ;;  %391 = vmatpush3.msra.mxu1 %v197_v23 }
  0x35   :  { %360 = vmatpush3.msra.mxu0 %v85_v11  ;;  %392 = vmatprep.subr.mxu1 %v196_v24 }
  0x36   :  { %361 = vmatprep.subr.mxu0 %v84_v12  ;;  %393 = vmatpush3.msra.mxu1 %v196_v24 }
  0x37   :  { %362 = vmatpush3.msra.mxu0 %v84_v12  ;;  %394 = vmatprep.subr.mxu1 %v195_v25 }
  0x38   :  { %363 = vmatprep.subr.mxu0 %v83_v13  ;;  %395 = vmatpush3.msra.mxu1 %v195_v25 }
  0x39   :  { %364 = vmatpush3.msra.mxu0 %v83_v13  ;;  %396 = vmatprep.subr.mxu1 %v194_v26 }
  0x3a   :  { %365 = vmatprep.subr.mxu0 %v82_v14  ;;  %397 = vmatpush3.msra.mxu1 %v194_v26 }
  0x3b   :  { %366 = vmatpush3.msra.mxu0 %v82_v14  ;;  %398 = vmatprep.subr.mxu1 %v193_v27 }
  0x3c   :  { %367 = vmatprep.subr.mxu0 %v81_v15  ;;  %399 = vmatpush3.msra.mxu1 %v193_v27 }
  0x3d   :  { %368 = vmatpush3.msra.mxu0 %v81_v15  ;;  %400 = vmatprep.subr.mxu1 %v192_v28 }
  0x3e   :  { %369 = vmatprep.subr.mxu0 %v80_v16  ;;  %401 = vmatpush3.msra.mxu1 %v192_v28 }
  0x3f   :  { %370 = vmatpush3.msra.mxu0 %v80_v16  ;;  %402 = vmatprep.subr.mxu1 %v191_v29 }
  0x40   :  { %371 = vmatprep.subr.mxu0 %v79_v17  ;;  %403 = vmatpush3.msra.mxu1 %v191_v29 }
  0x41   :  { %372 = vmatpush3.msra.mxu0 %v79_v17  ;;  %404 = vmatprep.subr.mxu1 %v190_v30 }
  0x42   :  { %373 = vmatprep.subr.mxu0 %v78_v18  ;;  %405 = vmatpush3.msra.mxu1 %v190_v30 }
  0x43   :  { %374 = vmatpush3.msra.mxu0 %v78_v18  ;;  %406 = vmatprep.subr.mxu1 %v189_v31 }
  0x44   :  { %375 = vmatprep.subr.mxu0 %v77_v19  ;;  %407 = vmatpush3.msra.mxu1 %v189_v31 }
  0x45   :  { %376 = vmatpush3.msra.mxu0 %v77_v19  ;;  %408 = vmatprep.subr.mxu1 %v188_v32 }
  0x46   :  { %378 = vmatmul.mubr.f32.vlgmr.msra.gmra.mxu0 %v76_v20  ;;  %409 = vmatpush3.msra.mxu1 %v188_v32 }
  0x47   :  { %410 = vmatprep.subr.mxu1 %v187_v33 }
  0x48   :  { %411 = vmatpush3.msra.mxu1 %v187_v33 }
 0x106   :  { %v379_v35 = vpop.f32.mrf.mxu0 }
 0x107   :  { %v172_v36 = vadd.f32 %v379_v35, %v308_v34 }
 0x108   :  { %v166_v37 = vpop.f32.mrf.mxu0 }
 0x109   :  { %v178_v38 = vmul.f32 0.70710677, %v172_v36  ;;  %v167_v39 = vadd.f32 %v308_v34, %v166_v37  ;;  %v176_v46 = vmul.f32 0.5, %v172_v36 }
 0x10b   :  { %421 = verf.f32 %v178_v38  ;;  %v177_v40 = vmul.f32 0.70710677, %v167_v39  ;;  %v175_v44 = vmul.f32 0.5, %v167_v39 }
 0x10d   :  { %423 = verf.f32 %v177_v40 }
 0x118   :  { %v422_v41 = vpop.eup %421 }
 0x119   :  { %v182_v43 = vadd.f32 1.0, %v422_v41 }
 0x11a   :  { %v424_v42 = vpop.eup %423 }
 0x11b   :  { %v181_v45 = vadd.f32 1.0, %v424_v42  ;;  %v184_v48 = vmul.f32 %v182_v43, %v176_v46 }
 0x11d   :  { %v183_v47 = vmul.f32 %v181_v45, %v175_v44 }
 0x11f   :  { %412 = vmatprep.mubr.f32.mxu1 %v183_v47 }
 0x120   :  { %413 = vmatmul.mubr.f32.vlgmr.msra.gmra.mxu1 %v184_v48 }
 0x1e0   :  { %v414_v50 = vpop.f32.mrf.mxu1 }
 0x1e1   :  { %v279_v51 = vadd.f32 %v414_v50, %v307_v49 }
 0x1e2   :  { %v269_v52 = vpop.f32.mrf.mxu1 }
 0x1e3   :  { %288 = vst [vmem:[#allocation9 + $0x8] sm:$0xff] %v279_v51  ;;  %v278_v53 = vadd.f32 %v307_v49, %v269_v52 }
 0x1e5   :  { %287 = vst [vmem:[#allocation9] sm:$0xff] %v278_v53 }
 0x1e6   :  { %496 = shalt.err (!%p493_p5)
}
 0x1e7   :  { %300 = dma.vmem_to_hbm [thread:$0]  %s295_s11, 256, %s582_s5, [#allocation5], %s513_s23, %s513_s23, %s514_s24  }
 0x1e8   :  { %509 = dma.done.wait [#allocation5], 256  }
 0x1e9   :  { %510 = vsyncadd [#allocation5], 4294967040 }
 0x1ea   :  { %304 = vsyncpa [#allocation4], 1 }
 0x1eb   :  { %305 = vsyncpa [#allocation7], 1 }
 0x1ec   :  { %306 = vsyncpa [#allocation5], 1 }

</bundles_post_ra>
